<compile_context>
chip_gen: v7x
topology: tpu7x:2x2x1
jax: 0.10.0
libtpu: 0.0.40
codegen_flags: <defaults>
</compile_context>

<pallas_src>
import functools

import jax
import jax.numpy as jnp
from jax.experimental import pallas as pl
from jax.experimental.pallas import tpu as pltpu


# --------------------------------------------------------------------------- fused kernel
def _mixed_model_kernel(x_ref, wih_ref, whh_ref, bi_ref, bhn_ref,
                        w1_ref, b1_ref, w2_ref, b2_ref,
                        o_ref, *, S, BN, H):
    """x_ref: (S*BN, D) time-major rows [t][b][sensor].  o_ref: (S*BN, out)."""
    # ---- hoisted input projection for ALL timesteps: one wide MXU matmul ----
    # gi = x @ [W_ir | W_iz | W_in] + [b_ir+b_hr | b_iz+b_hz | b_in]
    # Kept as a value (fits comfortably in vregs), not a VMEM scratch.
    gi = (jnp.dot(x_ref[...], wih_ref[...], preferred_element_type=jnp.float32)
          + bi_ref[...])                                           # (S*BN, 3H)

    w_hh = whh_ref[...]                                            # (H, 3H)
    w1 = w1_ref[...]                                               # (H, H)
    w2 = w2_ref[...]                                               # (H, out)
    # Broadcasts hoisted out of the unrolled loop (no CSE of broadcast_in_dim).
    b_hn = jnp.broadcast_to(bhn_ref[...], (BN, H))
    b1 = jnp.broadcast_to(b1_ref[...], (BN, w1.shape[1]))
    b2 = jnp.broadcast_to(b2_ref[...], (BN, w2.shape[1]))

    # ---- recurrence: fully unrolled over time, batched over all B*NS rows ----
    h = jnp.zeros((BN, H), jnp.float32)
    for t in range(S):                                             # static unroll
        gi_t = gi[t * BN:(t + 1) * BN, :]                          # aligned 8-row slice
        gh = jnp.dot(h, w_hh, preferred_element_type=jnp.float32)  # (BN, 3H)
        rz = jax.nn.sigmoid(gi_t[:, :2 * H] + gh[:, :2 * H])       # fused r|z sigmoid
        r = rz[:, :H]
        z = rz[:, H:]
        n = jnp.tanh(gi_t[:, 2 * H:] + r * (gh[:, 2 * H:] + b_hn))
        h = (1.0 - z) * n + z * h

        # ---- MLP decoder for step t (independent of step t+1 => hidden under
        #      the recurrence's serial-chain stalls by the scheduler) ----------
        hid = jnp.maximum(
            jnp.dot(h, w1, preferred_element_type=jnp.float32) + b1, 0.0)
        y_t = jnp.dot(hid, w2, preferred_element_type=jnp.float32) + b2
        o_ref[pl.ds(t * BN, BN), :] = y_t.astype(o_ref.dtype)      # aligned 8-row store


# --------------------------------------------------------------------------- wrapper
@jax.jit
def mixed_model_forward(src, packed):
    """src: (B, S, n_sensors, d_model) -> (B, S, n_sensors, output_size)."""
    B, S, NS, D = src.shape
    H = packed["w_hh"].shape[0]
    out_dim = packed["mlp_w2"].shape[-1]
    BN = B * NS
    M = S * BN

    # Time-major reorder (tiny XLA transpose, essentially free): rows become
    # [t][b][sensor] so every in-kernel per-step slice is tile-aligned.
    x_tm = jnp.transpose(src, (1, 0, 2, 3)).reshape(M, D).astype(jnp.float32)

    kernel = functools.partial(_mixed_model_kernel, S=S, BN=BN, H=H)
    vmem = pl.BlockSpec(memory_space=pltpu.MemorySpace.VMEM)
    y = pl.pallas_call(
        kernel,
        out_shape=jax.ShapeDtypeStruct((M, out_dim), jnp.float32),
        in_specs=[vmem] * 9,
        out_specs=vmem,
    )(
        x_tm,
        packed["w_ih"], packed["w_hh"], packed["b_i"], packed["b_hn"],
        packed["mlp_w1"], packed["mlp_b1"], packed["mlp_w2"], packed["mlp_b2"],
    )
    # Kernel output is time-major; undo with another free small transpose.
    return jnp.transpose(y.reshape(S, B, NS, out_dim), (1, 0, 2, 3))


def pack_params(params):
    """Pack torch-style per-gate GRU params into fused-kernel layout (done once)."""
    w_ih, w_hh = params["w_ih"], params["w_hh"]            # (3, D, H), (3, H, H)
    b_ih, b_hh = params["b_ih"], params["b_hh"]            # (3, 1, H)
    return {
        "w_ih": jnp.concatenate([w_ih[0], w_ih[1], w_ih[2]], axis=1),   # (D, 3H)
        "w_hh": jnp.concatenate([w_hh[0], w_hh[1], w_hh[2]], axis=1),   # (H, 3H)
        # r/z hidden biases folded into the input-side bias; n-gate keeps b_hn
        # separate because it is multiplied by r.
        "b_i": jnp.concatenate(
            [b_ih[0] + b_hh[0], b_ih[1] + b_hh[1], b_ih[2]], axis=1),   # (1, 3H)
        "b_hn": b_hh[2],                                                # (1, H)
        "mlp_w1": params["mlp_w1"], "mlp_b1": params["mlp_b1"],
        "mlp_w2": params["mlp_w2"], "mlp_b2": params["mlp_b2"],
    }


# --------------------------------------------------------------------------- reference (pure JAX)
def reference_forward(src, params):
    B, S, NS, D = src.shape
    H = params["w_hh"].shape[-1]
    x_tnd = jnp.transpose(src, (1, 0, 2, 3)).reshape(S, B * NS, D).astype(jnp.float32)
    h = jnp.zeros((B * NS, H), jnp.float32)
    outs = []
    for t in range(S):
        xt = x_tnd[t]
        r = jax.nn.sigmoid(xt @ params["w_ih"][0] + params["b_ih"][0]
                           + h @ params["w_hh"][0] + params["b_hh"][0])
        z = jax.nn.sigmoid(xt @ params["w_ih"][1] + params["b_ih"][1]
                           + h @ params["w_hh"][1] + params["b_hh"][1])
        n = jnp.tanh(xt @ params["w_ih"][2] + params["b_ih"][2]
                     + r * (h @ params["w_hh"][2] + params["b_hh"][2]))
        h = (1.0 - z) * n + z * h
        outs.append(h)
    h_all = jnp.stack(outs)                                            # (S, B*NS, H)
    y = jnp.maximum(h_all @ params["mlp_w1"] + params["mlp_b1"], 0.0)
    y = y @ params["mlp_w2"] + params["mlp_b2"]
    y = y.reshape(S, B, NS, -1)
    return jnp.transpose(y, (1, 0, 2, 3))


# --------------------------------------------------------------------------- main
if __name__ == "__main__":
    batch, seq_len, n_sensors = 2, 8, 4
    d_model = 32          # args.d_model
    hidden_size = 32      # args.hidden_size
    output_size = 32      # args.output_size (matches d_model per docstring)

    key = jax.random.PRNGKey(0)
    ks = jax.random.split(key, 8)
    scale = 1.0 / jnp.sqrt(hidden_size)

    params = {
        # GRU weights, gate order [r, z, n] as in torch.nn.GRU (stored transposed for x @ W)
        "w_ih": jax.random.uniform(ks[0], (3, d_model, hidden_size), jnp.float32, -scale, scale),
        "w_hh": jax.random.uniform(ks[1], (3, hidden_size, hidden_size), jnp.float32, -scale, scale),
        "b_ih": jax.random.uniform(ks[2], (3, 1, hidden_size), jnp.float32, -scale, scale),
        "b_hh": jax.random.uniform(ks[3], (3, 1, hidden_size), jnp.float32, -scale, scale),
        # MLP decoder (depth 2): Linear(H,H) -> ReLU -> Linear(H,out)
        "mlp_w1": jax.random.uniform(ks[4], (hidden_size, hidden_size), jnp.float32, -scale, scale),
        "mlp_b1": jax.random.uniform(ks[5], (1, hidden_size), jnp.float32, -scale, scale),
        "mlp_w2": jax.random.uniform(ks[6], (hidden_size, output_size), jnp.float32, -scale, scale),
        "mlp_b2": jax.random.uniform(ks[7], (1, output_size), jnp.float32, -scale, scale),
    }

    src = jax.random.normal(jax.random.PRNGKey(42),
                            (batch, seq_len, n_sensors, d_model), jnp.float32)

    packed = jax.tree_util.tree_map(jax.block_until_ready, pack_params(params))

    out = jax.block_until_ready(mixed_model_forward(src, packed))
    ref = jax.block_until_ready(reference_forward(src, params))

    assert out.shape == (batch, seq_len, n_sensors, output_size), out.shape
    assert jnp.allclose(out, ref, atol=1e-4, rtol=1e-4), \
        f"max err {jnp.max(jnp.abs(out - ref))}"

    print("KERNEL_OK")
</pallas_src>

<mosaic_0001>
module attributes {stable_mosaic.version = 11 : i64} {
  func.func @_mixed_model_kernel(%arg0: memref<64x32xf32, #tpu.memory_space<vmem>>, %arg1: memref<32x96xf32, #tpu.memory_space<vmem>>, %arg2: memref<32x96xf32, #tpu.memory_space<vmem>>, %arg3: memref<1x96xf32, #tpu.memory_space<vmem>>, %arg4: memref<1x32xf32, #tpu.memory_space<vmem>>, %arg5: memref<32x32xf32, #tpu.memory_space<vmem>>, %arg6: memref<1x32xf32, #tpu.memory_space<vmem>>, %arg7: memref<32x32xf32, #tpu.memory_space<vmem>>, %arg8: memref<1x32xf32, #tpu.memory_space<vmem>>, %arg9: memref<64x32xf32, #tpu.memory_space<vmem>>) attributes {dimension_semantics = [], scalar_prefetch = 0 : i64, scratch_operands = 0 : i64, tpu.core_type = #tpu.core_type<tc>} {
    %c0 = arith.constant 0 : index
    %c0_0 = arith.constant 0 : index
    %0 = vector.load %arg0[%c0, %c0_0] : memref<64x32xf32, #tpu.memory_space<vmem>>, vector<64x32xf32>
    %c0_1 = arith.constant 0 : index
    %c0_2 = arith.constant 0 : index
    %1 = vector.load %arg1[%c0_1, %c0_2] : memref<32x96xf32, #tpu.memory_space<vmem>>, vector<32x96xf32>
    %cst = arith.constant dense<0.000000e+00> : vector<64x96xf32>
    %2 = tpu.matmul %0, %1, %cst {dimension_numbers = #tpu.dot_dimension_numbers<[1], [0], [0], [1], [0, 0, 1, 1], [], []>} : vector<64x32xf32>, vector<32x96xf32>, vector<64x96xf32> -> vector<64x96xf32>
    %c0_3 = arith.constant 0 : index
    %c0_4 = arith.constant 0 : index
    %3 = vector.load %arg3[%c0_3, %c0_4] : memref<1x96xf32, #tpu.memory_space<vmem>>, vector<1x96xf32>
    %4 = vector.broadcast %3 : vector<1x96xf32> to vector<64x96xf32>
    %5 = arith.addf %2, %4 : vector<64x96xf32>
    %c0_5 = arith.constant 0 : index
    %c0_6 = arith.constant 0 : index
    %6 = vector.load %arg2[%c0_5, %c0_6] : memref<32x96xf32, #tpu.memory_space<vmem>>, vector<32x96xf32>
    %c0_7 = arith.constant 0 : index
    %c0_8 = arith.constant 0 : index
    %7 = vector.load %arg5[%c0_7, %c0_8] : memref<32x32xf32, #tpu.memory_space<vmem>>, vector<32x32xf32>
    %c0_9 = arith.constant 0 : index
    %c0_10 = arith.constant 0 : index
    %8 = vector.load %arg7[%c0_9, %c0_10] : memref<32x32xf32, #tpu.memory_space<vmem>>, vector<32x32xf32>
    %c0_11 = arith.constant 0 : index
    %c0_12 = arith.constant 0 : index
    %9 = vector.load %arg4[%c0_11, %c0_12] : memref<1x32xf32, #tpu.memory_space<vmem>>, vector<1x32xf32>
    %10 = vector.shape_cast %9 : vector<1x32xf32> to vector<1x32xf32>
    %11 = vector.broadcast %10 : vector<1x32xf32> to vector<8x32xf32>
    %c0_13 = arith.constant 0 : index
    %c0_14 = arith.constant 0 : index
    %12 = vector.load %arg6[%c0_13, %c0_14] : memref<1x32xf32, #tpu.memory_space<vmem>>, vector<1x32xf32>
    %13 = vector.shape_cast %12 : vector<1x32xf32> to vector<1x32xf32>
    %14 = vector.broadcast %13 : vector<1x32xf32> to vector<8x32xf32>
    %c0_15 = arith.constant 0 : index
    %c0_16 = arith.constant 0 : index
    %15 = vector.load %arg8[%c0_15, %c0_16] : memref<1x32xf32, #tpu.memory_space<vmem>>, vector<1x32xf32>
    %16 = vector.shape_cast %15 : vector<1x32xf32> to vector<1x32xf32>
    %17 = vector.broadcast %16 : vector<1x32xf32> to vector<8x32xf32>
    %cst_17 = arith.constant 0.000000e+00 : f32
    %18 = vector.broadcast %cst_17 : f32 to vector<8x32xf32>
    %19 = vector.extract_strided_slice %5 {offsets = [0, 0], sizes = [8, 96], strides = [1, 1]} : vector<64x96xf32> to vector<8x96xf32>
    %cst_18 = arith.constant dense<0.000000e+00> : vector<8x96xf32>
    %20 = tpu.matmul %18, %6, %cst_18 {dimension_numbers = #tpu.dot_dimension_numbers<[1], [0], [0], [1], [0, 0, 1, 1], [], []>} : vector<8x32xf32>, vector<32x96xf32>, vector<8x96xf32> -> vector<8x96xf32>
    %21 = vector.extract_strided_slice %19 {offsets = [0, 0], sizes = [8, 64], strides = [1, 1]} : vector<8x96xf32> to vector<8x64xf32>
    %22 = vector.extract_strided_slice %20 {offsets = [0, 0], sizes = [8, 64], strides = [1, 1]} : vector<8x96xf32> to vector<8x64xf32>
    %23 = arith.addf %21, %22 : vector<8x64xf32>
    %24 = arith.negf %23 : vector<8x64xf32>
    %25 = math.exp %24 : vector<8x64xf32>
    %cst_19 = arith.constant 1.000000e+00 : f32
    %26 = vector.broadcast %cst_19 : f32 to vector<8x64xf32>
    %27 = arith.addf %26, %25 : vector<8x64xf32>
    %28 = arith.divf %26, %27 : vector<8x64xf32>
    %29 = vector.extract_strided_slice %28 {offsets = [0, 0], sizes = [8, 32], strides = [1, 1]} : vector<8x64xf32> to vector<8x32xf32>
    %30 = vector.extract_strided_slice %28 {offsets = [0, 32], sizes = [8, 32], strides = [1, 1]} : vector<8x64xf32> to vector<8x32xf32>
    %31 = vector.extract_strided_slice %19 {offsets = [0, 64], sizes = [8, 32], strides = [1, 1]} : vector<8x96xf32> to vector<8x32xf32>
    %32 = vector.extract_strided_slice %20 {offsets = [0, 64], sizes = [8, 32], strides = [1, 1]} : vector<8x96xf32> to vector<8x32xf32>
    %33 = arith.addf %32, %11 : vector<8x32xf32>
    %34 = arith.mulf %29, %33 : vector<8x32xf32>
    %35 = arith.addf %31, %34 : vector<8x32xf32>
    %36 = math.tanh %35 : vector<8x32xf32>
    %cst_20 = arith.constant 1.000000e+00 : f32
    %37 = vector.broadcast %cst_20 : f32 to vector<8x32xf32>
    %38 = arith.subf %37, %30 : vector<8x32xf32>
    %39 = arith.mulf %38, %36 : vector<8x32xf32>
    %40 = arith.mulf %30, %18 : vector<8x32xf32>
    %41 = arith.addf %39, %40 : vector<8x32xf32>
    %cst_21 = arith.constant dense<0.000000e+00> : vector<8x32xf32>
    %42 = tpu.matmul %41, %7, %cst_21 {dimension_numbers = #tpu.dot_dimension_numbers<[1], [0], [0], [1], [0, 0, 1, 1], [], []>} : vector<8x32xf32>, vector<32x32xf32>, vector<8x32xf32> -> vector<8x32xf32>
    %43 = arith.addf %42, %14 : vector<8x32xf32>
    %cst_22 = arith.constant 0.000000e+00 : f32
    %44 = vector.broadcast %cst_22 : f32 to vector<8x32xf32>
    %45 = arith.maximumf %43, %44 : vector<8x32xf32>
    %cst_23 = arith.constant dense<0.000000e+00> : vector<8x32xf32>
    %46 = tpu.matmul %45, %8, %cst_23 {dimension_numbers = #tpu.dot_dimension_numbers<[1], [0], [0], [1], [0, 0, 1, 1], [], []>} : vector<8x32xf32>, vector<32x32xf32>, vector<8x32xf32> -> vector<8x32xf32>
    %47 = arith.addf %46, %17 : vector<8x32xf32>
    %c0_24 = arith.constant 0 : index
    %c0_25 = arith.constant 0 : index
    %48 = vector.load %arg9[%c0_24, %c0_25] : memref<64x32xf32, #tpu.memory_space<vmem>>, vector<8x32xf32>
    tpu.vector_store %arg9[%c0_24, %c0_25], %47 {strides = array<i32>} : memref<64x32xf32, #tpu.memory_space<vmem>>, vector<8x32xf32>,
    %49 = vector.extract_strided_slice %5 {offsets = [8, 0], sizes = [8, 96], strides = [1, 1]} : vector<64x96xf32> to vector<8x96xf32>
    %cst_26 = arith.constant dense<0.000000e+00> : vector<8x96xf32>
    %50 = tpu.matmul %41, %6, %cst_26 {dimension_numbers = #tpu.dot_dimension_numbers<[1], [0], [0], [1], [0, 0, 1, 1], [], []>} : vector<8x32xf32>, vector<32x96xf32>, vector<8x96xf32> -> vector<8x96xf32>
    %51 = vector.extract_strided_slice %49 {offsets = [0, 0], sizes = [8, 64], strides = [1, 1]} : vector<8x96xf32> to vector<8x64xf32>
    %52 = vector.extract_strided_slice %50 {offsets = [0, 0], sizes = [8, 64], strides = [1, 1]} : vector<8x96xf32> to vector<8x64xf32>
    %53 = arith.addf %51, %52 : vector<8x64xf32>
    %54 = arith.negf %53 : vector<8x64xf32>
    %55 = math.exp %54 : vector<8x64xf32>
    %cst_27 = arith.constant 1.000000e+00 : f32
    %56 = vector.broadcast %cst_27 : f32 to vector<8x64xf32>
    %57 = arith.addf %56, %55 : vector<8x64xf32>
    %58 = arith.divf %56, %57 : vector<8x64xf32>
    %59 = vector.extract_strided_slice %58 {offsets = [0, 0], sizes = [8, 32], strides = [1, 1]} : vector<8x64xf32> to vector<8x32xf32>
    %60 = vector.extract_strided_slice %58 {offsets = [0, 32], sizes = [8, 32], strides = [1, 1]} : vector<8x64xf32> to vector<8x32xf32>
    %61 = vector.extract_strided_slice %49 {offsets = [0, 64], sizes = [8, 32], strides = [1, 1]} : vector<8x96xf32> to vector<8x32xf32>
    %62 = vector.extract_strided_slice %50 {offsets = [0, 64], sizes = [8, 32], strides = [1, 1]} : vector<8x96xf32> to vector<8x32xf32>
    %63 = arith.addf %62, %11 : vector<8x32xf32>
    %64 = arith.mulf %59, %63 : vector<8x32xf32>
    %65 = arith.addf %61, %64 : vector<8x32xf32>
    %66 = math.tanh %65 : vector<8x32xf32>
    %cst_28 = arith.constant 1.000000e+00 : f32
    %67 = vector.broadcast %cst_28 : f32 to vector<8x32xf32>
    %68 = arith.subf %67, %60 : vector<8x32xf32>
    %69 = arith.mulf %68, %66 : vector<8x32xf32>
    %70 = arith.mulf %60, %41 : vector<8x32xf32>
    %71 = arith.addf %69, %70 : vector<8x32xf32>
    %cst_29 = arith.constant dense<0.000000e+00> : vector<8x32xf32>
    %72 = tpu.matmul %71, %7, %cst_29 {dimension_numbers = #tpu.dot_dimension_numbers<[1], [0], [0], [1], [0, 0, 1, 1], [], []>} : vector<8x32xf32>, vector<32x32xf32>, vector<8x32xf32> -> vector<8x32xf32>
    %73 = arith.addf %72, %14 : vector<8x32xf32>
    %cst_30 = arith.constant 0.000000e+00 : f32
    %74 = vector.broadcast %cst_30 : f32 to vector<8x32xf32>
    %75 = arith.maximumf %73, %74 : vector<8x32xf32>
    %cst_31 = arith.constant dense<0.000000e+00> : vector<8x32xf32>
    %76 = tpu.matmul %75, %8, %cst_31 {dimension_numbers = #tpu.dot_dimension_numbers<[1], [0], [0], [1], [0, 0, 1, 1], [], []>} : vector<8x32xf32>, vector<32x32xf32>, vector<8x32xf32> -> vector<8x32xf32>
    %77 = arith.addf %76, %17 : vector<8x32xf32>
    %c8 = arith.constant 8 : index
    %c0_32 = arith.constant 0 : index
    %78 = vector.load %arg9[%c8, %c0_32] : memref<64x32xf32, #tpu.memory_space<vmem>>, vector<8x32xf32>
    tpu.vector_store %arg9[%c8, %c0_32], %77 {strides = array<i32>} : memref<64x32xf32, #tpu.memory_space<vmem>>, vector<8x32xf32>,
    %79 = vector.extract_strided_slice %5 {offsets = [16, 0], sizes = [8, 96], strides = [1, 1]} : vector<64x96xf32> to vector<8x96xf32>
    %cst_33 = arith.constant dense<0.000000e+00> : vector<8x96xf32>
    %80 = tpu.matmul %71, %6, %cst_33 {dimension_numbers = #tpu.dot_dimension_numbers<[1], [0], [0], [1], [0, 0, 1, 1], [], []>} : vector<8x32xf32>, vector<32x96xf32>, vector<8x96xf32> -> vector<8x96xf32>
    %81 = vector.extract_strided_slice %79 {offsets = [0, 0], sizes = [8, 64], strides = [1, 1]} : vector<8x96xf32> to vector<8x64xf32>
    %82 = vector.extract_strided_slice %80 {offsets = [0, 0], sizes = [8, 64], strides = [1, 1]} : vector<8x96xf32> to vector<8x64xf32>
    %83 = arith.addf %81, %82 : vector<8x64xf32>
    %84 = arith.negf %83 : vector<8x64xf32>
    %85 = math.exp %84 : vector<8x64xf32>
    %cst_34 = arith.constant 1.000000e+00 : f32
    %86 = vector.broadcast %cst_34 : f32 to vector<8x64xf32>
    %87 = arith.addf %86, %85 : vector<8x64xf32>
    %88 = arith.divf %86, %87 : vector<8x64xf32>
    %89 = vector.extract_strided_slice %88 {offsets = [0, 0], sizes = [8, 32], strides = [1, 1]} : vector<8x64xf32> to vector<8x32xf32>
    %90 = vector.extract_strided_slice %88 {offsets = [0, 32], sizes = [8, 32], strides = [1, 1]} : vector<8x64xf32> to vector<8x32xf32>
    %91 = vector.extract_strided_slice %79 {offsets = [0, 64], sizes = [8, 32], strides = [1, 1]} : vector<8x96xf32> to vector<8x32xf32>
    %92 = vector.extract_strided_slice %80 {offsets = [0, 64], sizes = [8, 32], strides = [1, 1]} : vector<8x96xf32> to vector<8x32xf32>
    %93 = arith.addf %92, %11 : vector<8x32xf32>
    %94 = arith.mulf %89, %93 : vector<8x32xf32>
    %95 = arith.addf %91, %94 : vector<8x32xf32>
    %96 = math.tanh %95 : vector<8x32xf32>
    %cst_35 = arith.constant 1.000000e+00 : f32
    %97 = vector.broadcast %cst_35 : f32 to vector<8x32xf32>
    %98 = arith.subf %97, %90 : vector<8x32xf32>
    %99 = arith.mulf %98, %96 : vector<8x32xf32>
    %100 = arith.mulf %90, %71 : vector<8x32xf32>
    %101 = arith.addf %99, %100 : vector<8x32xf32>
    %cst_36 = arith.constant dense<0.000000e+00> : vector<8x32xf32>
    %102 = tpu.matmul %101, %7, %cst_36 {dimension_numbers = #tpu.dot_dimension_numbers<[1], [0], [0], [1], [0, 0, 1, 1], [], []>} : vector<8x32xf32>, vector<32x32xf32>, vector<8x32xf32> -> vector<8x32xf32>
    %103 = arith.addf %102, %14 : vector<8x32xf32>
    %cst_37 = arith.constant 0.000000e+00 : f32
    %104 = vector.broadcast %cst_37 : f32 to vector<8x32xf32>
    %105 = arith.maximumf %103, %104 : vector<8x32xf32>
    %cst_38 = arith.constant dense<0.000000e+00> : vector<8x32xf32>
    %106 = tpu.matmul %105, %8, %cst_38 {dimension_numbers = #tpu.dot_dimension_numbers<[1], [0], [0], [1], [0, 0, 1, 1], [], []>} : vector<8x32xf32>, vector<32x32xf32>, vector<8x32xf32> -> vector<8x32xf32>
    %107 = arith.addf %106, %17 : vector<8x32xf32>
    %c16 = arith.constant 16 : index
    %c0_39 = arith.constant 0 : index
    %108 = vector.load %arg9[%c16, %c0_39] : memref<64x32xf32, #tpu.memory_space<vmem>>, vector<8x32xf32>
    tpu.vector_store %arg9[%c16, %c0_39], %107 {strides = array<i32>} : memref<64x32xf32, #tpu.memory_space<vmem>>, vector<8x32xf32>,
    %109 = vector.extract_strided_slice %5 {offsets = [24, 0], sizes = [8, 96], strides = [1, 1]} : vector<64x96xf32> to vector<8x96xf32>
    %cst_40 = arith.constant dense<0.000000e+00> : vector<8x96xf32>
    %110 = tpu.matmul %101, %6, %cst_40 {dimension_numbers = #tpu.dot_dimension_numbers<[1], [0], [0], [1], [0, 0, 1, 1], [], []>} : vector<8x32xf32>, vector<32x96xf32>, vector<8x96xf32> -> vector<8x96xf32>
    %111 = vector.extract_strided_slice %109 {offsets = [0, 0], sizes = [8, 64], strides = [1, 1]} : vector<8x96xf32> to vector<8x64xf32>
    %112 = vector.extract_strided_slice %110 {offsets = [0, 0], sizes = [8, 64], strides = [1, 1]} : vector<8x96xf32> to vector<8x64xf32>
    %113 = arith.addf %111, %112 : vector<8x64xf32>
    %114 = arith.negf %113 : vector<8x64xf32>
    %115 = math.exp %114 : vector<8x64xf32>
    %cst_41 = arith.constant 1.000000e+00 : f32
    %116 = vector.broadcast %cst_41 : f32 to vector<8x64xf32>
    %117 = arith.addf %116, %115 : vector<8x64xf32>
    %118 = arith.divf %116, %117 : vector<8x64xf32>
    %119 = vector.extract_strided_slice %118 {offsets = [0, 0], sizes = [8, 32], strides = [1, 1]} : vector<8x64xf32> to vector<8x32xf32>
    %120 = vector.extract_strided_slice %118 {offsets = [0, 32], sizes = [8, 32], strides = [1, 1]} : vector<8x64xf32> to vector<8x32xf32>
    %121 = vector.extract_strided_slice %109 {offsets = [0, 64], sizes = [8, 32], strides = [1, 1]} : vector<8x96xf32> to vector<8x32xf32>
    %122 = vector.extract_strided_slice %110 {offsets = [0, 64], sizes = [8, 32], strides = [1, 1]} : vector<8x96xf32> to vector<8x32xf32>
    %123 = arith.addf %122, %11 : vector<8x32xf32>
    %124 = arith.mulf %119, %123 : vector<8x32xf32>
    %125 = arith.addf %121, %124 : vector<8x32xf32>
    %126 = math.tanh %125 : vector<8x32xf32>
    %cst_42 = arith.constant 1.000000e+00 : f32
    %127 = vector.broadcast %cst_42 : f32 to vector<8x32xf32>
    %128 = arith.subf %127, %120 : vector<8x32xf32>
    %129 = arith.mulf %128, %126 : vector<8x32xf32>
    %130 = arith.mulf %120, %101 : vector<8x32xf32>
    %131 = arith.addf %129, %130 : vector<8x32xf32>
    %cst_43 = arith.constant dense<0.000000e+00> : vector<8x32xf32>
    %132 = tpu.matmul %131, %7, %cst_43 {dimension_numbers = #tpu.dot_dimension_numbers<[1], [0], [0], [1], [0, 0, 1, 1], [], []>} : vector<8x32xf32>, vector<32x32xf32>, vector<8x32xf32> -> vector<8x32xf32>
    %133 = arith.addf %132, %14 : vector<8x32xf32>
    %cst_44 = arith.constant 0.000000e+00 : f32
    %134 = vector.broadcast %cst_44 : f32 to vector<8x32xf32>
    %135 = arith.maximumf %133, %134 : vector<8x32xf32>
    %cst_45 = arith.constant dense<0.000000e+00> : vector<8x32xf32>
    %136 = tpu.matmul %135, %8, %cst_45 {dimension_numbers = #tpu.dot_dimension_numbers<[1], [0], [0], [1], [0, 0, 1, 1], [], []>} : vector<8x32xf32>, vector<32x32xf32>, vector<8x32xf32> -> vector<8x32xf32>
    %137 = arith.addf %136, %17 : vector<8x32xf32>
    %c24 = arith.constant 24 : index
    %c0_46 = arith.constant 0 : index
    %138 = vector.load %arg9[%c24, %c0_46] : memref<64x32xf32, #tpu.memory_space<vmem>>, vector<8x32xf32>
    tpu.vector_store %arg9[%c24, %c0_46], %137 {strides = array<i32>} : memref<64x32xf32, #tpu.memory_space<vmem>>, vector<8x32xf32>,
    %139 = vector.extract_strided_slice %5 {offsets = [32, 0], sizes = [8, 96], strides = [1, 1]} : vector<64x96xf32> to vector<8x96xf32>
    %cst_47 = arith.constant dense<0.000000e+00> : vector<8x96xf32>
    %140 = tpu.matmul %131, %6, %cst_47 {dimension_numbers = #tpu.dot_dimension_numbers<[1], [0], [0], [1], [0, 0, 1, 1], [], []>} : vector<8x32xf32>, vector<32x96xf32>, vector<8x96xf32> -> vector<8x96xf32>
    %141 = vector.extract_strided_slice %139 {offsets = [0, 0], sizes = [8, 64], strides = [1, 1]} : vector<8x96xf32> to vector<8x64xf32>
    %142 = vector.extract_strided_slice %140 {offsets = [0, 0], sizes = [8, 64], strides = [1, 1]} : vector<8x96xf32> to vector<8x64xf32>
    %143 = arith.addf %141, %142 : vector<8x64xf32>
    %144 = arith.negf %143 : vector<8x64xf32>
    %145 = math.exp %144 : vector<8x64xf32>
    %cst_48 = arith.constant 1.000000e+00 : f32
    %146 = vector.broadcast %cst_48 : f32 to vector<8x64xf32>
    %147 = arith.addf %146, %145 : vector<8x64xf32>
    %148 = arith.divf %146, %147 : vector<8x64xf32>
    %149 = vector.extract_strided_slice %148 {offsets = [0, 0], sizes = [8, 32], strides = [1, 1]} : vector<8x64xf32> to vector<8x32xf32>
    %150 = vector.extract_strided_slice %148 {offsets = [0, 32], sizes = [8, 32], strides = [1, 1]} : vector<8x64xf32> to vector<8x32xf32>
    %151 = vector.extract_strided_slice %139 {offsets = [0, 64], sizes = [8, 32], strides = [1, 1]} : vector<8x96xf32> to vector<8x32xf32>
    %152 = vector.extract_strided_slice %140 {offsets = [0, 64], sizes = [8, 32], strides = [1, 1]} : vector<8x96xf32> to vector<8x32xf32>
    %153 = arith.addf %152, %11 : vector<8x32xf32>
    %154 = arith.mulf %149, %153 : vector<8x32xf32>
    %155 = arith.addf %151, %154 : vector<8x32xf32>
    %156 = math.tanh %155 : vector<8x32xf32>
    %cst_49 = arith.constant 1.000000e+00 : f32
    %157 = vector.broadcast %cst_49 : f32 to vector<8x32xf32>
    %158 = arith.subf %157, %150 : vector<8x32xf32>
    %159 = arith.mulf %158, %156 : vector<8x32xf32>
    %160 = arith.mulf %150, %131 : vector<8x32xf32>
    %161 = arith.addf %159, %160 : vector<8x32xf32>
    %cst_50 = arith.constant dense<0.000000e+00> : vector<8x32xf32>
    %162 = tpu.matmul %161, %7, %cst_50 {dimension_numbers = #tpu.dot_dimension_numbers<[1], [0], [0], [1], [0, 0, 1, 1], [], []>} : vector<8x32xf32>, vector<32x32xf32>, vector<8x32xf32> -> vector<8x32xf32>
    %163 = arith.addf %162, %14 : vector<8x32xf32>
    %cst_51 = arith.constant 0.000000e+00 : f32
    %164 = vector.broadcast %cst_51 : f32 to vector<8x32xf32>
    %165 = arith.maximumf %163, %164 : vector<8x32xf32>
    %cst_52 = arith.constant dense<0.000000e+00> : vector<8x32xf32>
    %166 = tpu.matmul %165, %8, %cst_52 {dimension_numbers = #tpu.dot_dimension_numbers<[1], [0], [0], [1], [0, 0, 1, 1], [], []>} : vector<8x32xf32>, vector<32x32xf32>, vector<8x32xf32> -> vector<8x32xf32>
    %167 = arith.addf %166, %17 : vector<8x32xf32>
    %c32 = arith.constant 32 : index
    %c0_53 = arith.constant 0 : index
    %168 = vector.load %arg9[%c32, %c0_53] : memref<64x32xf32, #tpu.memory_space<vmem>>, vector<8x32xf32>
    tpu.vector_store %arg9[%c32, %c0_53], %167 {strides = array<i32>} : memref<64x32xf32, #tpu.memory_space<vmem>>, vector<8x32xf32>,
    %169 = vector.extract_strided_slice %5 {offsets = [40, 0], sizes = [8, 96], strides = [1, 1]} : vector<64x96xf32> to vector<8x96xf32>
    %cst_54 = arith.constant dense<0.000000e+00> : vector<8x96xf32>
    %170 = tpu.matmul %161, %6, %cst_54 {dimension_numbers = #tpu.dot_dimension_numbers<[1], [0], [0], [1], [0, 0, 1, 1], [], []>} : vector<8x32xf32>, vector<32x96xf32>, vector<8x96xf32> -> vector<8x96xf32>
    %171 = vector.extract_strided_slice %169 {offsets = [0, 0], sizes = [8, 64], strides = [1, 1]} : vector<8x96xf32> to vector<8x64xf32>
    %172 = vector.extract_strided_slice %170 {offsets = [0, 0], sizes = [8, 64], strides = [1, 1]} : vector<8x96xf32> to vector<8x64xf32>
    %173 = arith.addf %171, %172 : vector<8x64xf32>
    %174 = arith.negf %173 : vector<8x64xf32>
    %175 = math.exp %174 : vector<8x64xf32>
    %cst_55 = arith.constant 1.000000e+00 : f32
    %176 = vector.broadcast %cst_55 : f32 to vector<8x64xf32>
    %177 = arith.addf %176, %175 : vector<8x64xf32>
    %178 = arith.divf %176, %177 : vector<8x64xf32>
    %179 = vector.extract_strided_slice %178 {offsets = [0, 0], sizes = [8, 32], strides = [1, 1]} : vector<8x64xf32> to vector<8x32xf32>
    %180 = vector.extract_strided_slice %178 {offsets = [0, 32], sizes = [8, 32], strides = [1, 1]} : vector<8x64xf32> to vector<8x32xf32>
    %181 = vector.extract_strided_slice %169 {offsets = [0, 64], sizes = [8, 32], strides = [1, 1]} : vector<8x96xf32> to vector<8x32xf32>
    %182 = vector.extract_strided_slice %170 {offsets = [0, 64], sizes = [8, 32], strides = [1, 1]} : vector<8x96xf32> to vector<8x32xf32>
    %183 = arith.addf %182, %11 : vector<8x32xf32>
    %184 = arith.mulf %179, %183 : vector<8x32xf32>
    %185 = arith.addf %181, %184 : vector<8x32xf32>
    %186 = math.tanh %185 : vector<8x32xf32>
    %cst_56 = arith.constant 1.000000e+00 : f32
    %187 = vector.broadcast %cst_56 : f32 to vector<8x32xf32>
    %188 = arith.subf %187, %180 : vector<8x32xf32>
    %189 = arith.mulf %188, %186 : vector<8x32xf32>
    %190 = arith.mulf %180, %161 : vector<8x32xf32>
    %191 = arith.addf %189, %190 : vector<8x32xf32>
    %cst_57 = arith.constant dense<0.000000e+00> : vector<8x32xf32>
    %192 = tpu.matmul %191, %7, %cst_57 {dimension_numbers = #tpu.dot_dimension_numbers<[1], [0], [0], [1], [0, 0, 1, 1], [], []>} : vector<8x32xf32>, vector<32x32xf32>, vector<8x32xf32> -> vector<8x32xf32>
    %193 = arith.addf %192, %14 : vector<8x32xf32>
    %cst_58 = arith.constant 0.000000e+00 : f32
    %194 = vector.broadcast %cst_58 : f32 to vector<8x32xf32>
    %195 = arith.maximumf %193, %194 : vector<8x32xf32>
    %cst_59 = arith.constant dense<0.000000e+00> : vector<8x32xf32>
    %196 = tpu.matmul %195, %8, %cst_59 {dimension_numbers = #tpu.dot_dimension_numbers<[1], [0], [0], [1], [0, 0, 1, 1], [], []>} : vector<8x32xf32>, vector<32x32xf32>, vector<8x32xf32> -> vector<8x32xf32>
    %197 = arith.addf %196, %17 : vector<8x32xf32>
    %c40 = arith.constant 40 : index
    %c0_60 = arith.constant 0 : index
    %198 = vector.load %arg9[%c40, %c0_60] : memref<64x32xf32, #tpu.memory_space<vmem>>, vector<8x32xf32>
    tpu.vector_store %arg9[%c40, %c0_60], %197 {strides = array<i32>} : memref<64x32xf32, #tpu.memory_space<vmem>>, vector<8x32xf32>,
    %199 = vector.extract_strided_slice %5 {offsets = [48, 0], sizes = [8, 96], strides = [1, 1]} : vector<64x96xf32> to vector<8x96xf32>
    %cst_61 = arith.constant dense<0.000000e+00> : vector<8x96xf32>
    %200 = tpu.matmul %191, %6, %cst_61 {dimension_numbers = #tpu.dot_dimension_numbers<[1], [0], [0], [1], [0, 0, 1, 1], [], []>} : vector<8x32xf32>, vector<32x96xf32>, vector<8x96xf32> -> vector<8x96xf32>
    %201 = vector.extract_strided_slice %199 {offsets = [0, 0], sizes = [8, 64], strides = [1, 1]} : vector<8x96xf32> to vector<8x64xf32>
    %202 = vector.extract_strided_slice %200 {offsets = [0, 0], sizes = [8, 64], strides = [1, 1]} : vector<8x96xf32> to vector<8x64xf32>
    %203 = arith.addf %201, %202 : vector<8x64xf32>
    %204 = arith.negf %203 : vector<8x64xf32>
    %205 = math.exp %204 : vector<8x64xf32>
    %cst_62 = arith.constant 1.000000e+00 : f32
    %206 = vector.broadcast %cst_62 : f32 to vector<8x64xf32>
    %207 = arith.addf %206, %205 : vector<8x64xf32>
    %208 = arith.divf %206, %207 : vector<8x64xf32>
    %209 = vector.extract_strided_slice %208 {offsets = [0, 0], sizes = [8, 32], strides = [1, 1]} : vector<8x64xf32> to vector<8x32xf32>
    %210 = vector.extract_strided_slice %208 {offsets = [0, 32], sizes = [8, 32], strides = [1, 1]} : vector<8x64xf32> to vector<8x32xf32>
    %211 = vector.extract_strided_slice %199 {offsets = [0, 64], sizes = [8, 32], strides = [1, 1]} : vector<8x96xf32> to vector<8x32xf32>
    %212 = vector.extract_strided_slice %200 {offsets = [0, 64], sizes = [8, 32], strides = [1, 1]} : vector<8x96xf32> to vector<8x32xf32>
    %213 = arith.addf %212, %11 : vector<8x32xf32>
    %214 = arith.mulf %209, %213 : vector<8x32xf32>
    %215 = arith.addf %211, %214 : vector<8x32xf32>
    %216 = math.tanh %215 : vector<8x32xf32>
    %cst_63 = arith.constant 1.000000e+00 : f32
    %217 = vector.broadcast %cst_63 : f32 to vector<8x32xf32>
    %218 = arith.subf %217, %210 : vector<8x32xf32>
    %219 = arith.mulf %218, %216 : vector<8x32xf32>
    %220 = arith.mulf %210, %191 : vector<8x32xf32>
    %221 = arith.addf %219, %220 : vector<8x32xf32>
    %cst_64 = arith.constant dense<0.000000e+00> : vector<8x32xf32>
    %222 = tpu.matmul %221, %7, %cst_64 {dimension_numbers = #tpu.dot_dimension_numbers<[1], [0], [0], [1], [0, 0, 1, 1], [], []>} : vector<8x32xf32>, vector<32x32xf32>, vector<8x32xf32> -> vector<8x32xf32>
    %223 = arith.addf %222, %14 : vector<8x32xf32>
    %cst_65 = arith.constant 0.000000e+00 : f32
    %224 = vector.broadcast %cst_65 : f32 to vector<8x32xf32>
    %225 = arith.maximumf %223, %224 : vector<8x32xf32>
    %cst_66 = arith.constant dense<0.000000e+00> : vector<8x32xf32>
    %226 = tpu.matmul %225, %8, %cst_66 {dimension_numbers = #tpu.dot_dimension_numbers<[1], [0], [0], [1], [0, 0, 1, 1], [], []>} : vector<8x32xf32>, vector<32x32xf32>, vector<8x32xf32> -> vector<8x32xf32>
    %227 = arith.addf %226, %17 : vector<8x32xf32>
    %c48 = arith.constant 48 : index
    %c0_67 = arith.constant 0 : index
    %228 = vector.load %arg9[%c48, %c0_67] : memref<64x32xf32, #tpu.memory_space<vmem>>, vector<8x32xf32>
    tpu.vector_store %arg9[%c48, %c0_67], %227 {strides = array<i32>} : memref<64x32xf32, #tpu.memory_space<vmem>>, vector<8x32xf32>,
    %229 = vector.extract_strided_slice %5 {offsets = [56, 0], sizes = [8, 96], strides = [1, 1]} : vector<64x96xf32> to vector<8x96xf32>
    %cst_68 = arith.constant dense<0.000000e+00> : vector<8x96xf32>
    %230 = tpu.matmul %221, %6, %cst_68 {dimension_numbers = #tpu.dot_dimension_numbers<[1], [0], [0], [1], [0, 0, 1, 1], [], []>} : vector<8x32xf32>, vector<32x96xf32>, vector<8x96xf32> -> vector<8x96xf32>
    %231 = vector.extract_strided_slice %229 {offsets = [0, 0], sizes = [8, 64], strides = [1, 1]} : vector<8x96xf32> to vector<8x64xf32>
    %232 = vector.extract_strided_slice %230 {offsets = [0, 0], sizes = [8, 64], strides = [1, 1]} : vector<8x96xf32> to vector<8x64xf32>
    %233 = arith.addf %231, %232 : vector<8x64xf32>
    %234 = arith.negf %233 : vector<8x64xf32>
    %235 = math.exp %234 : vector<8x64xf32>
    %cst_69 = arith.constant 1.000000e+00 : f32
    %236 = vector.broadcast %cst_69 : f32 to vector<8x64xf32>
    %237 = arith.addf %236, %235 : vector<8x64xf32>
    %238 = arith.divf %236, %237 : vector<8x64xf32>
    %239 = vector.extract_strided_slice %238 {offsets = [0, 0], sizes = [8, 32], strides = [1, 1]} : vector<8x64xf32> to vector<8x32xf32>
    %240 = vector.extract_strided_slice %238 {offsets = [0, 32], sizes = [8, 32], strides = [1, 1]} : vector<8x64xf32> to vector<8x32xf32>
    %241 = vector.extract_strided_slice %229 {offsets = [0, 64], sizes = [8, 32], strides = [1, 1]} : vector<8x96xf32> to vector<8x32xf32>
    %242 = vector.extract_strided_slice %230 {offsets = [0, 64], sizes = [8, 32], strides = [1, 1]} : vector<8x96xf32> to vector<8x32xf32>
    %243 = arith.addf %242, %11 : vector<8x32xf32>
    %244 = arith.mulf %239, %243 : vector<8x32xf32>
    %245 = arith.addf %241, %244 : vector<8x32xf32>
    %246 = math.tanh %245 : vector<8x32xf32>
    %cst_70 = arith.constant 1.000000e+00 : f32
    %247 = vector.broadcast %cst_70 : f32 to vector<8x32xf32>
    %248 = arith.subf %247, %240 : vector<8x32xf32>
    %249 = arith.mulf %248, %246 : vector<8x32xf32>
    %250 = arith.mulf %240, %221 : vector<8x32xf32>
    %251 = arith.addf %249, %250 : vector<8x32xf32>
    %cst_71 = arith.constant dense<0.000000e+00> : vector<8x32xf32>
    %252 = tpu.matmul %251, %7, %cst_71 {dimension_numbers = #tpu.dot_dimension_numbers<[1], [0], [0], [1], [0, 0, 1, 1], [], []>} : vector<8x32xf32>, vector<32x32xf32>, vector<8x32xf32> -> vector<8x32xf32>
    %253 = arith.addf %252, %14 : vector<8x32xf32>
    %cst_72 = arith.constant 0.000000e+00 : f32
    %254 = vector.broadcast %cst_72 : f32 to vector<8x32xf32>
    %255 = arith.maximumf %253, %254 : vector<8x32xf32>
    %cst_73 = arith.constant dense<0.000000e+00> : vector<8x32xf32>
    %256 = tpu.matmul %255, %8, %cst_73 {dimension_numbers = #tpu.dot_dimension_numbers<[1], [0], [0], [1], [0, 0, 1, 1], [], []>} : vector<8x32xf32>, vector<32x32xf32>, vector<8x32xf32> -> vector<8x32xf32>
    %257 = arith.addf %256, %17 : vector<8x32xf32>
    %c56 = arith.constant 56 : index
    %c0_74 = arith.constant 0 : index
    %258 = vector.load %arg9[%c56, %c0_74] : memref<64x32xf32, #tpu.memory_space<vmem>>, vector<8x32xf32>
    tpu.vector_store %arg9[%c56, %c0_74], %257 {strides = array<i32>} : memref<64x32xf32, #tpu.memory_space<vmem>>, vector<8x32xf32>,
    return
  }
}

</mosaic_0001>

<bundles_post_ra>
// kernel: mixed_model_forward.1
= control target key start
LH: loop header
LB: loop body
LE: loop exit
PB: predicated region body
PF: predicated region fallthrough
CT: control target
= control target key end

     0   :  { %v2863_v0 = vmov 0.0|0.0   ;;  %vm2864_vm0 = vmmov 0   ;;  %v2865_v4 = vmov 0.0   ;;  %vm51_vm1 = vcmask 261120   ;;  %s2867_s17 = smov 96   ;;  %s3320_s1 = inlined_call_operand.vmem [shape: f32[32,96], index: 1, kind: input, shape index: {}]   ;;  %s3321_s2 = inlined_call_operand.vmem [shape: f32[32,96], index: 2, kind: input, shape index: {}]   ;;  %s3322_s0 = inlined_call_operand.vmem [shape: f32[64,32], index: 0, kind: input, shape index: {}]   ;;  %s3323_s4 = inlined_call_operand.vmem [shape: f32[1,32], index: 4, kind: input, shape index: {}]   ;;  %s3324_s3 = inlined_call_operand.vmem [shape: f32[1,96], index: 3, kind: input, shape index: {}]   ;;  %s3325_s5 = inlined_call_operand.vmem [shape: f32[32,32], index: 5, kind: input, shape index: {}]   ;;  %s3326_s7 = inlined_call_operand.vmem [shape: f32[32,32], index: 7, kind: input, shape index: {}]   ;;  %s3327_s6 = inlined_call_operand.vmem [shape: f32[1,32], index: 6, kind: input, shape index: {}]   ;;  %s3328_s8 = inlined_call_operand.vmem [shape: f32[1,32], index: 8, kind: input, shape index: {}]   ;;  %s3329_s9 = inlined_call_operand.vmem [shape: f32[64,32], index: 9, kind: output, shape index: {}]  }
   0x1   :  { %2666 = vmatprep.subr.bf16.mxu1 %v2863_v0  ;;  %v40_v1 = vld [vmem:[%s3320_s1] sm:$0xff]  ;;  %v41_v2 = vld [vmem:[%s3320_s1 + $0x8] sm:$0xff]  ;;  %2402 = vmatprep.mubr.msk.f32.mxu1 %vm2864_vm0, %v2865_v4  ;;  %v42_v7 = vld [vmem:[%s3320_s1 + $0x10] sm:$0xff] }
   0x2   :  { %v181_v3 = vld [vmem:[%s3321_s2] sm:$0xff]  ;;  %v2658_v5 = vpack.c.bf16 %v41_v2, %v40_v1  ;;  %v182_v6 = vld [vmem:[%s3321_s2 + $0x8] sm:$0xff]  ;;  %v43_v8 = vld [vmem:[%s3320_s1 + $0x18] sm:$0xff] }
   0x3   :  { %v2939_v9 = vpack.c.bf16 %v182_v6, %v181_v3  ;;  %v2662_v10 = vpack.c.bf16 %v43_v8, %v42_v7  ;;  %v183_v11 = vld [vmem:[%s3321_s2 + $0x10] sm:$0xff]  ;;  %v184_v12 = vld [vmem:[%s3321_s2 + $0x18] sm:$0xff]  ;;  %v32_v13 = vld [vmem:[%s3322_s0] sm:$0xff]  ;;  %s2866_s2 = smov 64  }
   0x4   :  { %2659 = vmatprep.subr.bf16.mxu0 %v2658_v5  ;;  %2382 = vmatprep.mubr.msk.f32.mxu0 %vm51_vm1, %v32_v13  ;;  %v2208_v14 = vld [vmem:[%s3323_s4] ss:$0 sm:$0xff]  ;;  %v2955_v15 = vpack.c.bf16 %v184_v12, %v183_v11  ;;  %v33_v16 = vld [vmem:[%s3322_s0 + $0x8] sm:$0xff]  ;;  %v187_v36 = vld [vmem:[%s3325_s5 + $0x10] sm:$0xff] }
   0x5   :  { %2668 = vmatpush3.bf16.msra.mxu1 %v2939_v9  ;;  %2661 = vmatpush3.bf16.msra.mxu0 %v2658_v5  ;;  %v2978_v23 = vld [vmem:[%s3324_s3] ss:$0 sm:$0xff]  ;;  %v186_v35 = vld [vmem:[%s3325_s5 + $0x8] sm:$0xff]  ;;  %v188_v38 = vld [vmem:[%s3325_s5 + $0x18] sm:$0xff] }
   0x6   :  { %2669 = vmatprep.subr.bf16.mxu1 %v2863_v0  ;;  %2663 = vmatprep.subr.bf16.mxu0 %v2662_v10  ;;  %v185_v34 = vld [vmem:[%s3325_s5] sm:$0xff]  ;;  %v2997_v39 = vpack.c.bf16 %v188_v38, %v187_v36  ;;  %v34_v43 = vld [vmem:[%s3322_s0 + $0x10] sm:$0xff]  ;;  %v35_v44 = vld [vmem:[%s3322_s0 + $0x18] sm:$0xff] }
   0x7   :  { %293 = vrot.lane.b32.xlu0 %v2208_v14, %s2866_s2  ;;  %v2991_v37 = vpack.c.bf16 %v186_v35, %v185_v34  ;;  %v36_v45 = vld [vmem:[%s3322_s0 + $0x20] sm:$0xff]  ;;  %v190_v49 = vld [vmem:[%s3326_s7 + $0x8] sm:$0xff]  ;;  %v38_v53 = vld [vmem:[%s3322_s0 + $0x30] sm:$0xff] }
   0x8   :  { %v189_v48 = vld [vmem:[%s3326_s7] sm:$0xff]  ;;  %v37_v52 = vld [vmem:[%s3322_s0 + $0x28] sm:$0xff]  ;;  %v191_v55 = vld [vmem:[%s3326_s7 + $0x10] sm:$0xff] }
   0x9   :  { %2671 = vmatpush3.bf16.msra.mxu1 %v2955_v15  ;;  %2665 = vmatpush3.bf16.msra.mxu0 %v2662_v10  ;;  %v3020_v50 = vpack.c.bf16 %v190_v49, %v189_v48  ;;  %v192_v56 = vld [vmem:[%s3326_s7 + $0x18] sm:$0xff]  ;;  %v3070_v59 = vld [vmem:[%s3327_s6] ss:$0 sm:$0xff] }
   0xa   :  { %2672 = vmatprep.subr.bf16.mxu1 %v2863_v0  ;;  %2678 = vmatprep.subr.bf16.mxu0 %v2863_v0  ;;  %v39_v57 = vld [vmem:[%s3322_s0 + $0x38] sm:$0xff]  ;;  %v3058_v58 = vpack.c.bf16 %v192_v56, %v191_v55 }
   0xc   :  { %2403 = vmatmul.mubr.f32.vlgmr.msra.gmra.mrb[0].mxu1 %v2865_v4  ;;  %2383 = vmatmul.mubr.msk.f32.vlgmr.msra.gmra.mrb[0].mxu0 %vm51_vm1, %v33_v16 }
   0xd   :  { %2413 = vmatprep.mubr.msk.f32.mxu1 %vm2864_vm0, %v2865_v4  ;;  %2674 = vmatpush3.bf16.msra.mxu1 %v2991_v37 }
   0xe   :  { %2675 = vmatprep.subr.bf16.mxu1 %v2863_v0  ;;  %2385 = vmatprep.mubr.msk.f32.mxu0 %vm51_vm1, %v34_v43 }
   0xf   :  { %2680 = vmatpush3.bf16.msra.mxu0 %v3020_v50 }
  0x10   :  { %2386 = vmatmul.mubr.msk.f32.gmra.mrb[2].mxu0 %vm51_vm1, %v35_v44  ;;  %2681 = vmatprep.subr.bf16.mxu0 %v2863_v0 }
  0x11   :  { %2677 = vmatpush3.bf16.msra.mxu1 %v2997_v39  ;;  %2388 = vmatprep.mubr.msk.f32.mxu0 %vm51_vm1, %v36_v45 }
  0x12   :  { %2684 = vmatprep.subr.bf16.mxu1 %v2863_v0 }
  0x13   :  { %2683 = vmatpush3.bf16.msra.mxu0 %v3058_v58 }
  0x14   :  { %2389 = vmatmul.mubr.msk.f32.gmra.mrb[4].mxu0 %vm51_vm1, %v37_v52  ;;  %2690 = vmatprep.subr.bf16.mxu0 %v2863_v0 }
  0x15   :  { %2391 = vmatprep.mubr.msk.f32.mxu0 %vm51_vm1, %v38_v53 }
  0x18   :  { %2392 = vmatmul.mubr.msk.f32.gmra.mrb[6].mxu0 %vm51_vm1, %v39_v57 }
  0x19   :  { %2424 = vmatprep.mubr.msk.f32.mxu0 %vm2864_vm0, %v2865_v4 }
  0x79   :  { %v2969_v17 = vpop.permute.xlu0 %293 }
  0xdf   :  { %v282_v18 = vpop.f32.mrb[0].mxu1  ;;  %v2971_v19 = vpop.f32.mrb[0].mxu0 }
  0xe0   :  { %v296_v20 = vadd.f32 %v2969_v17, %v282_v18  ;;  %v2404_v21 = vpop.f32.mrb[1].mxu1  ;;  %v142_v22 = vpop.f32.mrb[1].mxu0  ;;  %v148_v12 = vadd.f32 %v2971_v19, %v2978_v23 }
  0xe1   :  { %v143_v24 = vadd.f32 %v2978_v23, %v142_v22 }
  0xe2   :  { %298 = vrot.lane.b32.xlu0 %v296_v20, %s2866_s2 }
  0xe3   :  { %v286_v25 = vadd.f32 %v282_v18, %v143_v24  ;;  %v3072_v61 = vpop.f32.mrb[2].mxu0 }
  0xe4   :  { %v3075_v1 = vpop.f32.mrb[3].mxu0 }
  0xe5   :  { %v2211_v26 = vmul.f32 -1.442695, %v286_v25  ;;  %v153_v45 = vadd.f32 %v2978_v23, %v3075_v1 }
  0xe7   :  { %2815 = vpow2.f32 %v2211_v26  ;;  %v3077_v2 = vpop.f32.mrb[4].mxu0 }
  0xe8   :  { %v3079_v5 = vpop.f32.mrb[5].mxu0 }
  0xeb   :  { %v3090_v10 = vpop.f32.mrb[6].mxu0 }
  0xec   :  { %v3092_v11 = vpop.f32.mrb[7].mxu0 }
  0xf1   :  { %v2816_v27 = vpop.eup %2815 }
  0xf2   :  { %v290_v28 = vadd.f32 1.0, %v2816_v27 }
  0xf4   :  { %2817 = vrcp.f32 %v290_v28 }
  0xfe   :  { %v2818_v29 = vpop.eup %2817 }
  0xff   :  { %v308_v41 = vsub.f32 1.0, %v2818_v29  ;;  %v314_v46 = vmul.f32 0.0, %v2818_v29 }
 0x154   :  { %v299_v30 = vpop.permute.xlu0 %298 }
 0x155   :  { %v301_v31 = vmul.f32 %v2818_v29, %v299_v30 }
 0x157   :  { %303 = vrot.lane.b32.xlu1 %v301_v31, %s2866_s2 }
 0x1c9   :  { %v304_v32 = vpop.permute.xlu1 %303 }
 0x1ca   :  { %v306_v33 = vadd.f32 %v304_v32, %v143_v24  ;;  %v3100_v24 = vld [vmem:[%s3328_s8] ss:$0 sm:$0xff] }
 0x1cc   :  { %2819 = vtanh.f32 %v306_v33 }
 0x1d6   :  { %v2820_v40 = vpop.eup %2819 }
 0x1d7   :  { %310 = vrot.lane.b32.xlu1 %v2820_v40, %s2867_s17 }
 0x249   :  { %v311_v42 = vpop.permute.xlu1 %310 }
 0x24a   :  { %v313_v47 = vmul.f32 %v311_v42, %v308_v41 }
 0x24c   :  { %v3022_v51 = vadd.f32 %v314_v46, %v313_v47 }
 0x24e   :  { %317 = vrot.lane.b32.xlu0 %v3022_v51, %s2867_s17 }
 0x2c0   :  { %v318_v54 = vpop.permute.xlu0 %317 }
 0x2c1   :  { %2414 = vmatmul.mubr.msk.f32.vlgmr.msra.gmra.mrb[2].mxu1 %vm51_vm1, %v318_v54 }
 0x2c2   :  { %2686 = vmatpush3.bf16.msra.mxu1 %v2939_v9  ;;  %2435 = vmatprep.mubr.msk.f32.mxu1 %vm2864_vm0, %v2865_v4 }
 0x2c3   :  { %2687 = vmatprep.subr.bf16.mxu1 %v2863_v0 }
 0x2c6   :  { %2689 = vmatpush3.bf16.msra.mxu1 %v2955_v15 }
 0x2c7   :  { %2696 = vmatprep.subr.bf16.mxu1 %v2863_v0 }
 0x2c9   :  { %2436 = vmatmul.mubr.msk.f32.vlgmr.msra.gmra.mrb[4].mxu1 %vm51_vm1, %v318_v54 }
 0x2ca   :  { %2698 = vmatpush3.bf16.msra.mxu1 %v3020_v50  ;;  %2457 = vmatprep.mubr.msk.f32.mxu1 %vm2864_vm0, %v2865_v4 }
 0x2cb   :  { %2699 = vmatprep.subr.bf16.mxu1 %v2863_v0 }
 0x2ce   :  { %2701 = vmatpush3.bf16.msra.mxu1 %v3058_v58 }
 0x2cf   :  { %2708 = vmatprep.subr.bf16.mxu1 %v2863_v0 }
 0x394   :  { %v387_v60 = vpop.f32.mrb[2].mxu1 }
 0x395   :  { %v388_v62 = vadd.f32 %v3070_v59, %v387_v60  ;;  %v2415_v63 = vpop.f32.mrb[3].mxu1 }
 0x397   :  { %v391_v3 = vmax.f32 %v388_v62, 0.0 }
 0x399   :  { %2425 = vmatmul.mubr.msk.f32.vlgmr.msra.gmra.mrb[8].mxu0 %vm51_vm1, %v391_v3 }
 0x39a   :  { %2692 = vmatpush3.bf16.msra.mxu0 %v2991_v37  ;;  %2446 = vmatprep.mubr.msk.f32.mxu0 %vm2864_vm0, %v2865_v4 }
 0x39b   :  { %2693 = vmatprep.subr.bf16.mxu0 %v2863_v0 }
 0x39c   :  { %v532_v6 = vpop.f32.mrb[4].mxu1 }
 0x39d   :  { %v543_v7 = vadd.f32 %v532_v6, %v2969_v17  ;;  %v2437_v8 = vpop.f32.mrb[5].mxu1  ;;  %v536_v13 = vadd.f32 %v532_v6, %v148_v12 }
 0x39e   :  { %2695 = vmatpush3.bf16.msra.mxu0 %v2997_v39 }
 0x39f   :  { %545 = vrot.lane.b32.xlu1 %v543_v7, %s2866_s2  ;;  %2702 = vmatprep.subr.bf16.mxu0 %v2863_v0  ;;  %v2215_v14 = vmul.f32 -1.442695, %v536_v13 }
 0x3a1   :  { %2821 = vpow2.f32 %v2215_v14 }
 0x3ab   :  { %v2822_v16 = vpop.eup %2821 }
 0x3ac   :  { %v540_v18 = vadd.f32 1.0, %v2822_v16 }
 0x3ae   :  { %2823 = vrcp.f32 %v540_v18 }
 0x3b8   :  { %v2824_v20 = vpop.eup %2823 }
 0x3b9   :  { %v555_v30 = vsub.f32 1.0, %v2824_v20  ;;  %v561_v32 = vmul.f32 %v2824_v20, %v3022_v51 }
 0x411   :  { %v546_v21 = vpop.permute.xlu1 %545 }
 0x412   :  { %v548_v22 = vmul.f32 %v2824_v20, %v546_v21 }
 0x414   :  { %550 = vrot.lane.b32.xlu0 %v548_v22, %s2866_s2  ;;  %v158_v22 = vadd.f32 %v3072_v61, %v2978_v23 }
 0x46c   :  { %v461_v25 = vpop.f32.mrb[8].mxu0 }
 0x46d   :  { %v462_v26 = vadd.f32 %v3100_v24, %v461_v25  ;;  %v2426_v19 = vpop.f32.mrb[9].mxu0 }
 0x46f   :  { %465 = vst.msk [vmem:[%s3329_s9] sm:$0xff] %vm51_vm1, %v462_v26 }
 0x486   :  { %v551_v27 = vpop.permute.xlu0 %550 }
 0x487   :  { %v553_v28 = vadd.f32 %v551_v27, %v148_v12 }
 0x489   :  { %2825 = vtanh.f32 %v553_v28 }
 0x493   :  { %v2826_v29 = vpop.eup %2825 }
 0x494   :  { %557 = vrot.lane.b32.xlu1 %v2826_v29, %s2867_s17 }
 0x506   :  { %v558_v31 = vpop.permute.xlu1 %557 }
 0x507   :  { %v560_v33 = vmul.f32 %v558_v31, %v555_v30 }
 0x509   :  { %v562_v34 = vadd.f32 %v561_v32, %v560_v33 }
 0x50b   :  { %564 = vrot.lane.b32.xlu0 %v562_v34, %s2867_s17 }
 0x57d   :  { %v565_v35 = vpop.permute.xlu0 %564 }
 0x57e   :  { %2447 = vmatmul.mubr.msk.f32.vlgmr.msra.gmra.mrb[10].mxu0 %vm51_vm1, %v565_v35 }
 0x57f   :  { %2704 = vmatpush3.bf16.msra.mxu0 %v2939_v9  ;;  %2468 = vmatprep.mubr.msk.f32.mxu0 %vm2864_vm0, %v2865_v4 }
 0x580   :  { %2705 = vmatprep.subr.bf16.mxu0 %v2863_v0 }
 0x583   :  { %2707 = vmatpush3.bf16.msra.mxu0 %v2955_v15 }
 0x584   :  { %2714 = vmatprep.subr.bf16.mxu0 %v2863_v0 }
 0x586   :  { %2469 = vmatmul.mubr.msk.f32.vlgmr.msra.gmra.mrb[12].mxu0 %vm51_vm1, %v565_v35 }
 0x587   :  { %2716 = vmatpush3.bf16.msra.mxu0 %v3020_v50  ;;  %2490 = vmatprep.mubr.msk.f32.mxu0 %vm2864_vm0, %v2865_v4 }
 0x588   :  { %2717 = vmatprep.subr.bf16.mxu0 %v2863_v0 }
 0x58b   :  { %2719 = vmatpush3.bf16.msra.mxu0 %v3058_v58 }
 0x58c   :  { %2726 = vmatprep.subr.bf16.mxu0 %v2863_v0 }
 0x651   :  { %v634_v36 = vpop.f32.mrb[10].mxu0 }
 0x652   :  { %v635_v38 = vadd.f32 %v3070_v59, %v634_v36  ;;  %v2448_v40 = vpop.f32.mrb[11].mxu0 }
 0x654   :  { %v638_v41 = vmax.f32 %v635_v38, 0.0 }
 0x656   :  { %2458 = vmatmul.mubr.msk.f32.vlgmr.msra.gmra.mrb[6].mxu1 %vm51_vm1, %v638_v41 }
 0x657   :  { %2710 = vmatpush3.bf16.msra.mxu1 %v2991_v37  ;;  %2479 = vmatprep.mubr.msk.f32.mxu1 %vm2864_vm0, %v2865_v4 }
 0x658   :  { %2711 = vmatprep.subr.bf16.mxu1 %v2863_v0 }
 0x659   :  { %v779_v42 = vpop.f32.mrb[12].mxu0 }
 0x65a   :  { %v790_v43 = vadd.f32 %v779_v42, %v2969_v17  ;;  %v2470_v44 = vpop.f32.mrb[13].mxu0  ;;  %v783_v46 = vadd.f32 %v779_v42, %v153_v45 }
 0x65b   :  { %2713 = vmatpush3.bf16.msra.mxu1 %v2997_v39 }
 0x65c   :  { %792 = vrot.lane.b32.xlu1 %v790_v43, %s2866_s2  ;;  %2720 = vmatprep.subr.bf16.mxu1 %v2863_v0  ;;  %v2219_v47 = vmul.f32 -1.442695, %v783_v46 }
 0x65e   :  { %2827 = vpow2.f32 %v2219_v47 }
 0x668   :  { %v2828_v48 = vpop.eup %2827 }
 0x669   :  { %v787_v49 = vadd.f32 1.0, %v2828_v48 }
 0x66b   :  { %2829 = vrcp.f32 %v787_v49 }
 0x675   :  { %v2830_v51 = vpop.eup %2829 }
 0x676   :  { %v802_v63 = vsub.f32 1.0, %v2830_v51  ;;  %v808_v3 = vmul.f32 %v2830_v51, %v562_v34 }
 0x6ce   :  { %v793_v52 = vpop.permute.xlu1 %792 }
 0x6cf   :  { %v795_v53 = vmul.f32 %v2830_v51, %v793_v52  ;;  %v163_v52 = vadd.f32 %v2978_v23, %v3079_v5 }
 0x6d1   :  { %797 = vrot.lane.b32.xlu0 %v795_v53, %s2866_s2 }
 0x729   :  { %v708_v54 = vpop.f32.mrb[6].mxu1 }
 0x72a   :  { %v709_v55 = vadd.f32 %v3100_v24, %v708_v54  ;;  %v2459_v56 = vpop.f32.mrb[7].mxu1 }
 0x72c   :  { %712 = vst.msk [vmem:[%s3329_s9 + $0x8] sm:$0xff] %vm51_vm1, %v709_v55 }
 0x743   :  { %v798_v57 = vpop.permute.xlu0 %797 }
 0x744   :  { %v800_v60 = vadd.f32 %v798_v57, %v153_v45 }
 0x746   :  { %2831 = vtanh.f32 %v800_v60 }
 0x750   :  { %v2832_v62 = vpop.eup %2831 }
 0x751   :  { %804 = vrot.lane.b32.xlu1 %v2832_v62, %s2867_s17 }
 0x7c3   :  { %v805_v1 = vpop.permute.xlu1 %804 }
 0x7c4   :  { %v807_v6 = vmul.f32 %v805_v1, %v802_v63 }
 0x7c6   :  { %v809_v7 = vadd.f32 %v808_v3, %v807_v6 }
 0x7c8   :  { %811 = vrot.lane.b32.xlu0 %v809_v7, %s2867_s17 }
 0x83a   :  { %v812_v8 = vpop.permute.xlu0 %811 }
 0x83b   :  { %2480 = vmatmul.mubr.msk.f32.vlgmr.msra.gmra.mrb[8].mxu1 %vm51_vm1, %v812_v8 }
 0x83c   :  { %2722 = vmatpush3.bf16.msra.mxu1 %v2939_v9  ;;  %2501 = vmatprep.mubr.msk.f32.mxu1 %vm2864_vm0, %v2865_v4 }
 0x83d   :  { %2723 = vmatprep.subr.bf16.mxu1 %v2863_v0 }
 0x840   :  { %2725 = vmatpush3.bf16.msra.mxu1 %v2955_v15 }
 0x841   :  { %2732 = vmatprep.subr.bf16.mxu1 %v2863_v0 }
 0x843   :  { %2502 = vmatmul.mubr.msk.f32.vlgmr.msra.gmra.mrb[10].mxu1 %vm51_vm1, %v812_v8 }
 0x844   :  { %2734 = vmatpush3.bf16.msra.mxu1 %v3020_v50  ;;  %2523 = vmatprep.mubr.msk.f32.mxu1 %vm2864_vm0, %v2865_v4 }
 0x845   :  { %2735 = vmatprep.subr.bf16.mxu1 %v2863_v0 }
 0x848   :  { %2737 = vmatpush3.bf16.msra.mxu1 %v3058_v58 }
 0x849   :  { %2744 = vmatprep.subr.bf16.mxu1 %v2863_v0 }
 0x90e   :  { %v881_v12 = vpop.f32.mrb[8].mxu1 }
 0x90f   :  { %v882_v13 = vadd.f32 %v3070_v59, %v881_v12  ;;  %v2481_v14 = vpop.f32.mrb[9].mxu1 }
 0x911   :  { %v885_v16 = vmax.f32 %v882_v13, 0.0 }
 0x913   :  { %2491 = vmatmul.mubr.msk.f32.vlgmr.msra.gmra.mrb[14].mxu0 %vm51_vm1, %v885_v16 }
 0x914   :  { %2728 = vmatpush3.bf16.msra.mxu0 %v2991_v37  ;;  %2512 = vmatprep.mubr.msk.f32.mxu0 %vm2864_vm0, %v2865_v4 }
 0x915   :  { %2729 = vmatprep.subr.bf16.mxu0 %v2863_v0 }
 0x916   :  { %v1026_v18 = vpop.f32.mrb[10].mxu1 }
 0x917   :  { %v1037_v20 = vadd.f32 %v1026_v18, %v2969_v17  ;;  %v2503_v21 = vpop.f32.mrb[11].mxu1  ;;  %v1030_v25 = vadd.f32 %v1026_v18, %v158_v22 }
 0x918   :  { %2731 = vmatpush3.bf16.msra.mxu0 %v2997_v39 }
 0x919   :  { %1039 = vrot.lane.b32.xlu1 %v1037_v20, %s2866_s2  ;;  %2738 = vmatprep.subr.bf16.mxu0 %v2863_v0  ;;  %v2223_v26 = vmul.f32 -1.442695, %v1030_v25 }
 0x91b   :  { %2833 = vpow2.f32 %v2223_v26 }
 0x925   :  { %v2834_v19 = vpop.eup %2833 }
 0x926   :  { %v1034_v27 = vadd.f32 1.0, %v2834_v19 }
 0x928   :  { %2835 = vrcp.f32 %v1034_v27 }
 0x932   :  { %v2836_v28 = vpop.eup %2835 }
 0x933   :  { %v1049_v36 = vsub.f32 1.0, %v2836_v28  ;;  %v1055_v40 = vmul.f32 %v2836_v28, %v809_v7 }
 0x98b   :  { %v1040_v29 = vpop.permute.xlu1 %1039 }
 0x98c   :  { %v1042_v30 = vmul.f32 %v2836_v28, %v1040_v29  ;;  %v168_v28 = vadd.f32 %v3077_v2, %v2978_v23 }
 0x98e   :  { %1044 = vrot.lane.b32.xlu0 %v1042_v30, %s2866_s2 }
 0x9e6   :  { %v955_v31 = vpop.f32.mrb[14].mxu0 }
 0x9e7   :  { %v956_v32 = vadd.f32 %v3100_v24, %v955_v31  ;;  %v2492_v33 = vpop.f32.mrb[15].mxu0 }
 0x9e9   :  { %959 = vst.msk [vmem:[%s3329_s9 + $0x10] sm:$0xff] %vm51_vm1, %v956_v32 }
 0xa00   :  { %v1045_v61 = vpop.permute.xlu0 %1044 }
 0xa01   :  { %v1047_v34 = vadd.f32 %v1045_v61, %v158_v22 }
 0xa03   :  { %2837 = vtanh.f32 %v1047_v34 }
 0xa0d   :  { %v2838_v35 = vpop.eup %2837 }
 0xa0e   :  { %1051 = vrot.lane.b32.xlu1 %v2838_v35, %s2867_s17 }
 0xa80   :  { %v1052_v38 = vpop.permute.xlu1 %1051 }
 0xa81   :  { %v1054_v41 = vmul.f32 %v1052_v38, %v1049_v36 }
 0xa83   :  { %v1056_v42 = vadd.f32 %v1055_v40, %v1054_v41 }
 0xa85   :  { %1058 = vrot.lane.b32.xlu0 %v1056_v42, %s2867_s17 }
 0xaf7   :  { %v1059_v43 = vpop.permute.xlu0 %1058 }
 0xaf8   :  { %2513 = vmatmul.mubr.msk.f32.vlgmr.msra.gmra.mrb[16].mxu0 %vm51_vm1, %v1059_v43 }
 0xaf9   :  { %2740 = vmatpush3.bf16.msra.mxu0 %v2939_v9  ;;  %2534 = vmatprep.mubr.msk.f32.mxu0 %vm2864_vm0, %v2865_v4 }
 0xafa   :  { %2741 = vmatprep.subr.bf16.mxu0 %v2863_v0 }
 0xafd   :  { %2743 = vmatpush3.bf16.msra.mxu0 %v2955_v15 }
 0xafe   :  { %2750 = vmatprep.subr.bf16.mxu0 %v2863_v0 }
 0xb00   :  { %2535 = vmatmul.mubr.msk.f32.vlgmr.msra.gmra.mrb[18].mxu0 %vm51_vm1, %v1059_v43 }
 0xb01   :  { %2752 = vmatpush3.bf16.msra.mxu0 %v3020_v50  ;;  %2556 = vmatprep.mubr.msk.f32.mxu0 %vm2864_vm0, %v2865_v4 }
 0xb02   :  { %2753 = vmatprep.subr.bf16.mxu0 %v2863_v0 }
 0xb05   :  { %2755 = vmatpush3.bf16.msra.mxu0 %v3058_v58 }
 0xb06   :  { %2762 = vmatprep.subr.bf16.mxu0 %v2863_v0 }
 0xbcb   :  { %v1128_v44 = vpop.f32.mrb[16].mxu0 }
 0xbcc   :  { %v1129_v45 = vadd.f32 %v3070_v59, %v1128_v44  ;;  %v2514_v46 = vpop.f32.mrb[17].mxu0 }
 0xbce   :  { %v1132_v47 = vmax.f32 %v1129_v45, 0.0 }
 0xbd0   :  { %2524 = vmatmul.mubr.msk.f32.vlgmr.msra.gmra.mrb[12].mxu1 %vm51_vm1, %v1132_v47 }
 0xbd1   :  { %2746 = vmatpush3.bf16.msra.mxu1 %v2991_v37  ;;  %2545 = vmatprep.mubr.msk.f32.mxu1 %vm2864_vm0, %v2865_v4 }
 0xbd2   :  { %2747 = vmatprep.subr.bf16.mxu1 %v2863_v0 }
 0xbd3   :  { %v1273_v48 = vpop.f32.mrb[18].mxu0 }
 0xbd4   :  { %v1284_v49 = vadd.f32 %v1273_v48, %v2969_v17  ;;  %v2536_v51 = vpop.f32.mrb[19].mxu0  ;;  %v1277_v53 = vadd.f32 %v1273_v48, %v163_v52 }
 0xbd5   :  { %2749 = vmatpush3.bf16.msra.mxu1 %v2997_v39 }
 0xbd6   :  { %1286 = vrot.lane.b32.xlu1 %v1284_v49, %s2866_s2  ;;  %2756 = vmatprep.subr.bf16.mxu1 %v2863_v0  ;;  %v2227_v54 = vmul.f32 -1.442695, %v1277_v53 }
 0xbd8   :  { %2839 = vpow2.f32 %v2227_v54 }
 0xbe2   :  { %v2840_v55 = vpop.eup %2839 }
 0xbe3   :  { %v1281_v56 = vadd.f32 1.0, %v2840_v55 }
 0xbe5   :  { %2841 = vrcp.f32 %v1281_v56  ;;  %v173_v56 = vadd.f32 %v2978_v23, %v3092_v11 }
 0xbef   :  { %v2842_v57 = vpop.eup %2841 }
 0xbf0   :  { %v1296_v8 = vsub.f32 1.0, %v2842_v57  ;;  %v1302_v13 = vmul.f32 %v2842_v57, %v1056_v42 }
 0xc48   :  { %v1287_v60 = vpop.permute.xlu1 %1286 }
 0xc49   :  { %v1289_v62 = vmul.f32 %v2842_v57, %v1287_v60 }
 0xc4b   :  { %1291 = vrot.lane.b32.xlu0 %v1289_v62, %s2866_s2 }
 0xca3   :  { %v1202_v63 = vpop.f32.mrb[12].mxu1 }
 0xca4   :  { %v1203_v1 = vadd.f32 %v3100_v24, %v1202_v63  ;;  %v2525_v3 = vpop.f32.mrb[13].mxu1 }
 0xca6   :  { %1206 = vst.msk [vmem:[%s3329_s9 + $0x18] sm:$0xff] %vm51_vm1, %v1203_v1 }
 0xcbd   :  { %v1292_v5 = vpop.permute.xlu0 %1291 }
 0xcbe   :  { %v1294_v6 = vadd.f32 %v1292_v5, %v163_v52 }
 0xcc0   :  { %2843 = vtanh.f32 %v1294_v6 }
 0xcca   :  { %v2844_v7 = vpop.eup %2843 }
 0xccb   :  { %1298 = vrot.lane.b32.xlu1 %v2844_v7, %s2867_s17 }
 0xd3d   :  { %v1299_v12 = vpop.permute.xlu1 %1298 }
 0xd3e   :  { %v1301_v14 = vmul.f32 %v1299_v12, %v1296_v8 }
 0xd40   :  { %v1303_v16 = vadd.f32 %v1302_v13, %v1301_v14 }
 0xd42   :  { %1305 = vrot.lane.b32.xlu0 %v1303_v16, %s2867_s17 }
 0xdb4   :  { %v1306_v18 = vpop.permute.xlu0 %1305 }
 0xdb5   :  { %2546 = vmatmul.mubr.msk.f32.vlgmr.msra.gmra.mrb[14].mxu1 %vm51_vm1, %v1306_v18 }
 0xdb6   :  { %2758 = vmatpush3.bf16.msra.mxu1 %v2939_v9  ;;  %2567 = vmatprep.mubr.msk.f32.mxu1 %vm2864_vm0, %v2865_v4 }
 0xdb7   :  { %2759 = vmatprep.subr.bf16.mxu1 %v2863_v0 }
 0xdba   :  { %2761 = vmatpush3.bf16.msra.mxu1 %v2955_v15 }
 0xdbb   :  { %2768 = vmatprep.subr.bf16.mxu1 %v2863_v0 }
 0xdbd   :  { %2568 = vmatmul.mubr.msk.f32.vlgmr.msra.gmra.mrb[16].mxu1 %vm51_vm1, %v1306_v18 }
 0xdbe   :  { %2770 = vmatpush3.bf16.msra.mxu1 %v3020_v50  ;;  %2589 = vmatprep.mubr.msk.f32.mxu1 %vm2864_vm0, %v2865_v4 }
 0xdbf   :  { %2771 = vmatprep.subr.bf16.mxu1 %v2863_v0 }
 0xdc2   :  { %2773 = vmatpush3.bf16.msra.mxu1 %v3058_v58 }
 0xdc3   :  { %2780 = vmatprep.subr.bf16.mxu1 %v2863_v0 }
 0xe88   :  { %v1375_v20 = vpop.f32.mrb[14].mxu1 }
 0xe89   :  { %v1376_v21 = vadd.f32 %v3070_v59, %v1375_v20  ;;  %v2547_v22 = vpop.f32.mrb[15].mxu1 }
 0xe8b   :  { %v1379_v25 = vmax.f32 %v1376_v21, 0.0 }
 0xe8d   :  { %2557 = vmatmul.mubr.msk.f32.vlgmr.msra.gmra.mrb[20].mxu0 %vm51_vm1, %v1379_v25 }
 0xe8e   :  { %2764 = vmatpush3.bf16.msra.mxu0 %v2991_v37  ;;  %2578 = vmatprep.mubr.msk.f32.mxu0 %vm2864_vm0, %v2865_v4 }
 0xe8f   :  { %2765 = vmatprep.subr.bf16.mxu0 %v2863_v0 }
 0xe90   :  { %v1520_v26 = vpop.f32.mrb[16].mxu1 }
 0xe91   :  { %v1531_v19 = vadd.f32 %v1520_v26, %v2969_v17  ;;  %v2569_v27 = vpop.f32.mrb[17].mxu1  ;;  %v1524_v29 = vadd.f32 %v1520_v26, %v168_v28 }
 0xe92   :  { %2767 = vmatpush3.bf16.msra.mxu0 %v2997_v39 }
 0xe93   :  { %1533 = vrot.lane.b32.xlu1 %v1531_v19, %s2866_s2  ;;  %2774 = vmatprep.subr.bf16.mxu0 %v2863_v0  ;;  %v2231_v30 = vmul.f32 -1.442695, %v1524_v29 }
 0xe95   :  { %2845 = vpow2.f32 %v2231_v30 }
 0xe9f   :  { %v2846_v31 = vpop.eup %2845 }
 0xea0   :  { %v1528_v32 = vadd.f32 1.0, %v2846_v31 }
 0xea2   :  { %2847 = vrcp.f32 %v1528_v32 }
 0xeac   :  { %v2848_v33 = vpop.eup %2847 }
 0xead   :  { %v1543_v42 = vsub.f32 1.0, %v2848_v33  ;;  %v1549_v44 = vmul.f32 %v2848_v33, %v1303_v16 }
 0xf05   :  { %v1534_v61 = vpop.permute.xlu1 %1533 }
 0xf06   :  { %v1536_v34 = vmul.f32 %v2848_v33, %v1534_v61 }
 0xf08   :  { %1538 = vrot.lane.b32.xlu0 %v1536_v34, %s2866_s2 }
 0xf60   :  { %v1449_v35 = vpop.f32.mrb[20].mxu0 }
 0xf61   :  { %v1450_v36 = vadd.f32 %v3100_v24, %v1449_v35  ;;  %v2558_v38 = vpop.f32.mrb[21].mxu0 }
 0xf63   :  { %1453 = vst.msk [vmem:[%s3329_s9 + $0x20] sm:$0xff] %vm51_vm1, %v1450_v36 }
 0xf7a   :  { %v1539_v2 = vpop.permute.xlu0 %1538 }
 0xf7b   :  { %v1541_v40 = vadd.f32 %v1539_v2, %v168_v28 }
 0xf7d   :  { %2849 = vtanh.f32 %v1541_v40 }
 0xf87   :  { %v2850_v41 = vpop.eup %2849 }
 0xf88   :  { %1545 = vrot.lane.b32.xlu1 %v2850_v41, %s2867_s17 }
 0xffa   :  { %v1546_v43 = vpop.permute.xlu1 %1545 }
 0xffb   :  { %v1548_v45 = vmul.f32 %v1546_v43, %v1543_v42 }
 0xffd   :  { %v1550_v46 = vadd.f32 %v1549_v44, %v1548_v45 }
 0xfff   :  { %1552 = vrot.lane.b32.xlu0 %v1550_v46, %s2867_s17 }
0x1071   :  { %v1553_v47 = vpop.permute.xlu0 %1552 }
0x1072   :  { %2579 = vmatmul.mubr.msk.f32.vlgmr.msra.gmra.mrb[22].mxu0 %vm51_vm1, %v1553_v47 }
0x1073   :  { %2776 = vmatpush3.bf16.msra.mxu0 %v2939_v9  ;;  %2600 = vmatprep.mubr.msk.f32.mxu0 %vm2864_vm0, %v2865_v4 }
0x1074   :  { %2777 = vmatprep.subr.bf16.mxu0 %v2863_v0 }
0x1077   :  { %2779 = vmatpush3.bf16.msra.mxu0 %v2955_v15 }
0x1078   :  { %2786 = vmatprep.subr.bf16.mxu0 %v2863_v0 }
0x107a   :  { %2601 = vmatmul.mubr.msk.f32.vlgmr.msra.gmra.mrb[24].mxu0 %vm51_vm1, %v1553_v47 }
0x107b   :  { %2788 = vmatpush3.bf16.msra.mxu0 %v3020_v50  ;;  %2622 = vmatprep.mubr.msk.f32.mxu0 %vm2864_vm0, %v2865_v4 }
0x107c   :  { %2789 = vmatprep.subr.bf16.mxu0 %v2863_v0 }
0x107f   :  { %2791 = vmatpush3.bf16.msra.mxu0 %v3058_v58 }
0x1080   :  { %2798 = vmatprep.subr.bf16.mxu0 %v2863_v0 }
0x1145   :  { %v1622_v48 = vpop.f32.mrb[22].mxu0 }
0x1146   :  { %v1623_v49 = vadd.f32 %v3070_v59, %v1622_v48  ;;  %v2580_v51 = vpop.f32.mrb[23].mxu0 }
0x1148   :  { %v1626_v52 = vmax.f32 %v1623_v49, 0.0 }
0x114a   :  { %2590 = vmatmul.mubr.msk.f32.vlgmr.msra.gmra.mrb[18].mxu1 %vm51_vm1, %v1626_v52 }
0x114b   :  { %2782 = vmatpush3.bf16.msra.mxu1 %v2991_v37  ;;  %2611 = vmatprep.mubr.msk.f32.mxu1 %vm2864_vm0, %v2865_v4 }
0x114c   :  { %2783 = vmatprep.subr.bf16.mxu1 %v2863_v0 }
0x114d   :  { %v1767_v53 = vpop.f32.mrb[24].mxu0 }
0x114e   :  { %v1778_v54 = vadd.f32 %v1767_v53, %v2969_v17  ;;  %v2602_v55 = vpop.f32.mrb[25].mxu0  ;;  %v1771_v57 = vadd.f32 %v1767_v53, %v173_v56 }
0x114f   :  { %2785 = vmatpush3.bf16.msra.mxu1 %v2997_v39 }
0x1150   :  { %1780 = vrot.lane.b32.xlu1 %v1778_v54, %s2866_s2  ;;  %2792 = vmatprep.subr.bf16.mxu1 %v2863_v0  ;;  %v2235_v60 = vmul.f32 -1.442695, %v1771_v57 }
0x1152   :  { %2851 = vpow2.f32 %v2235_v60 }
0x115c   :  { %v2852_v62 = vpop.eup %2851 }
0x115d   :  { %v1775_v63 = vadd.f32 1.0, %v2852_v62 }
0x115f   :  { %2853 = vrcp.f32 %v1775_v63 }
0x1169   :  { %v2854_v1 = vpop.eup %2853 }
0x116a   :  { %v1790_v14 = vsub.f32 1.0, %v2854_v1  ;;  %v1796_v18 = vmul.f32 %v2854_v1, %v1550_v46 }
0x11c2   :  { %v1781_v3 = vpop.permute.xlu1 %1780 }
0x11c3   :  { %v1783_v5 = vmul.f32 %v2854_v1, %v1781_v3 }
0x11c5   :  { %1785 = vrot.lane.b32.xlu0 %v1783_v5, %s2866_s2 }
0x121d   :  { %v1696_v6 = vpop.f32.mrb[18].mxu1 }
0x121e   :  { %v1697_v7 = vadd.f32 %v3100_v24, %v1696_v6  ;;  %v2591_v8 = vpop.f32.mrb[19].mxu1 }
0x1220   :  { %1700 = vst.msk [vmem:[%s3329_s9 + $0x28] sm:$0xff] %vm51_vm1, %v1697_v7 }
0x1237   :  { %v1786_v11 = vpop.permute.xlu0 %1785 }
0x1238   :  { %v1788_v12 = vadd.f32 %v1786_v11, %v173_v56 }
0x123a   :  { %2855 = vtanh.f32 %v1788_v12 }
0x1244   :  { %v2856_v13 = vpop.eup %2855 }
0x1245   :  { %1792 = vrot.lane.b32.xlu1 %v2856_v13, %s2867_s17 }
0x12b7   :  { %v1793_v16 = vpop.permute.xlu1 %1792 }
0x12b8   :  { %v1795_v20 = vmul.f32 %v1793_v16, %v1790_v14 }
0x12ba   :  { %v1797_v21 = vadd.f32 %v1796_v18, %v1795_v20 }
0x12bc   :  { %1799 = vrot.lane.b32.xlu0 %v1797_v21, %s2867_s17 }
0x132e   :  { %v1800_v22 = vpop.permute.xlu0 %1799 }
0x132f   :  { %2612 = vmatmul.mubr.msk.f32.vlgmr.msra.gmra.mrb[20].mxu1 %vm51_vm1, %v1800_v22 }
0x1330   :  { %2794 = vmatpush3.bf16.msra.mxu1 %v2939_v9  ;;  %2633 = vmatprep.mubr.msk.f32.mxu1 %vm2864_vm0, %v2865_v4 }
0x1331   :  { %2795 = vmatprep.subr.bf16.mxu1 %v2863_v0 }
0x1334   :  { %2797 = vmatpush3.bf16.msra.mxu1 %v2955_v15 }
0x1335   :  { %2804 = vmatprep.subr.bf16.mxu1 %v2863_v0 }
0x1337   :  { %2634 = vmatmul.mubr.msk.f32.vlgmr.msra.gmra.mrb[22].mxu1 %vm51_vm1, %v1800_v22 }
0x1338   :  { %2806 = vmatpush3.bf16.msra.mxu1 %v3020_v50  ;;  %2655 = vmatprep.mubr.msk.f32.mxu1 %vm2864_vm0, %v2865_v4 }
0x1339   :  { %2807 = vmatprep.subr.bf16.mxu1 %v2863_v0 }
0x133c   :  { %2809 = vmatpush3.bf16.msra.mxu1 %v3058_v58  ;;  %v178_v58 = vadd.f32 %v3090_v10, %v2978_v23 }
0x1402   :  { %v1869_v9 = vpop.f32.mrb[20].mxu1 }
0x1403   :  { %v1870_v25 = vadd.f32 %v3070_v59, %v1869_v9  ;;  %v2613_v26 = vpop.f32.mrb[21].mxu1 }
0x1405   :  { %v1873_v19 = vmax.f32 %v1870_v25, 0.0 }
0x1407   :  { %2623 = vmatmul.mubr.msk.f32.vlgmr.msra.gmra.mrb[26].mxu0 %vm51_vm1, %v1873_v19 }
0x1408   :  { %2800 = vmatpush3.bf16.msra.mxu0 %v2991_v37  ;;  %2644 = vmatprep.mubr.msk.f32.mxu0 %vm2864_vm0, %v2865_v4 }
0x1409   :  { %2801 = vmatprep.subr.bf16.mxu0 %v2863_v0 }
0x140a   :  { %v2014_v15 = vpop.f32.mrb[22].mxu1 }
0x140b   :  { %v2025_v50 = vadd.f32 %v2014_v15, %v2969_v17  ;;  %v2635_v27 = vpop.f32.mrb[23].mxu1  ;;  %v2018_v28 = vadd.f32 %v2014_v15, %v178_v58 }
0x140c   :  { %2803 = vmatpush3.bf16.msra.mxu0 %v2997_v39 }
0x140d   :  { %2027 = vrot.lane.b32.xlu1 %v2025_v50, %s2866_s2  ;;  %v2239_v29 = vmul.f32 -1.442695, %v2018_v28 }
0x140f   :  { %2857 = vpow2.f32 %v2239_v29 }
0x1419   :  { %v2858_v37 = vpop.eup %2857 }
0x141a   :  { %v2022_v30 = vadd.f32 1.0, %v2858_v37 }
0x141c   :  { %2859 = vrcp.f32 %v2022_v30 }
0x1426   :  { %v2860_v4 = vpop.eup %2859 }
0x1427   :  { %v2037_v61 = vsub.f32 1.0, %v2860_v4  ;;  %v2043_v35 = vmul.f32 %v2860_v4, %v1797_v21 }
0x147f   :  { %v2028_v31 = vpop.permute.xlu1 %2027 }
0x1480   :  { %v2030_v0 = vmul.f32 %v2860_v4, %v2028_v31 }
0x1482   :  { %2032 = vrot.lane.b32.xlu0 %v2030_v0, %s2866_s2 }
0x14da   :  { %v1943_v17 = vpop.f32.mrb[26].mxu0 }
0x14db   :  { %v1944_v32 = vadd.f32 %v3100_v24, %v1943_v17  ;;  %v2624_v39 = vpop.f32.mrb[27].mxu0 }
0x14dd   :  { %1947 = vst.msk [vmem:[%s3329_s9 + $0x30] sm:$0xff] %vm51_vm1, %v1944_v32 }
0x14f4   :  { %v2033_v23 = vpop.permute.xlu0 %2032 }
0x14f5   :  { %v2035_v10 = vadd.f32 %v2033_v23, %v178_v58 }
0x14f7   :  { %2861 = vtanh.f32 %v2035_v10 }
0x1501   :  { %v2862_v33 = vpop.eup %2861 }
0x1502   :  { %2039 = vrot.lane.b32.xlu1 %v2862_v33, %s2867_s17 }
0x1574   :  { %v2040_v34 = vpop.permute.xlu1 %2039 }
0x1575   :  { %v2042_v36 = vmul.f32 %v2040_v34, %v2037_v61 }
0x1577   :  { %v2044_v38 = vadd.f32 %v2043_v35, %v2042_v36 }
0x1579   :  { %2046 = vrot.lane.b32.xlu0 %v2044_v38, %s2867_s17 }
0x15eb   :  { %v2047_v2 = vpop.permute.xlu0 %2046 }
0x15ec   :  { %2645 = vmatmul.mubr.msk.f32.vlgmr.msra.gmra.mrb[28].mxu0 %vm51_vm1, %v2047_v2 }
0x16bf   :  { %v2116_v40 = vpop.f32.mrb[28].mxu0 }
0x16c0   :  { %v2117_v41 = vadd.f32 %v3070_v59, %v2116_v40  ;;  %v2646_v42 = vpop.f32.mrb[29].mxu0 }
0x16c2   :  { %v2120_v43 = vmax.f32 %v2117_v41, 0.0 }
0x16c4   :  { %2656 = vmatmul.mubr.msk.f32.vlgmr.msra.gmra.mrb[24].mxu1 %vm51_vm1, %v2120_v43 }
0x1797   :  { %v2190_v44 = vpop.f32.mrb[24].mxu1 }
0x1798   :  { %v2191_v45 = vadd.f32 %v3100_v24, %v2190_v44  ;;  %v2657_v46 = vpop.f32.mrb[25].mxu1 }
0x179a   :  { %2194 = vst.msk [vmem:[%s3329_s9 + $0x38] sm:$0xff] %vm51_vm1, %v2191_v45 }

</bundles_post_ra>
